<compile_context>
chip_gen: v6e
topology: v6e:2x2x1
jax: 0.10.0
libtpu: 0.0.40
codegen_flags: <defaults>
</compile_context>

<pallas_src>
import jax
import jax.numpy as jnp
from jax.experimental import pallas as pl
from jax.experimental.pallas import tpu as pltpu


def _taskc_kernel(x_ref, w_ref, b_ref, o_ref):
    # x_ref: (TB, D) VMEM, w_ref: (D, 1) VMEM (resident across grid steps),
    # b_ref: (1, 1) SMEM scalar, o_ref: (1, 1, TB) VMEM lane-dense output row.
    logits = jnp.dot(x_ref[...], w_ref[...],
                     preferred_element_type=jnp.float32)       # (TB, 1) on MXU
    # Relayout the sublane-sparse (TB, 1) column into a lane-dense row (cheap:
    # TB * 4 bytes) so sigmoid / cast / store operate on full vregs.
    row = logits.reshape(o_ref.shape) + b_ref[0, 0]            # (1, 1, TB)
    o_ref[...] = jax.nn.sigmoid(row).astype(o_ref.dtype)


def _pick_batch_tile(B, D, itemsize, target_tile_bytes=8 << 20, max_rows=1 << 15):
    """Rows per batch tile: ~target_tile_bytes of x per step, multiple of 8."""
    rows = target_tile_bytes // max(D * itemsize, 1)
    rows = max(8, min(int(rows), max_rows))
    rows = (rows // 8) * 8
    if B <= rows:
        return B  # single block == full array dims (always a legal block shape)
    return rows


def _vmem_limit_bytes(TB, D, itemsize):
    x_bufs = 2 * TB * D * itemsize        # double-buffered x tiles
    out_bufs = 2 * 8 * TB * 4             # double-buffered (1,1,TB) row (padded)
    w_buf = 2 * D * 128 * 4               # (D, 1) column pads to 128 lanes
    limit = x_bufs + out_bufs + w_buf + (2 << 20)  # headroom
    return int(max(16 << 20, min(limit, 48 << 20)))


def taskc_forward(x, w, b):
    """sigmoid(x @ w + b).  x: [B, D], w: reshapeable to [D, 1], b: 1 element."""
    B, D = x.shape
    itemsize = jnp.dtype(x.dtype).itemsize
    w_col = jnp.reshape(w, (D, 1)).astype(x.dtype)    # MXU rhs, streamed once
    b2 = jnp.reshape(b, (1, 1)).astype(jnp.float32)   # SMEM scalar

    # TODO(synk): add a D-tiling grid axis (f32 VMEM accumulator with pl.when
    # init/finalize) if d_model ever gets so large that an (8, D) tile no
    # longer fits scoped VMEM; unnecessary for typical d_model.
    TB = _pick_batch_tile(B, D, itemsize)
    num_tiles = pl.cdiv(B, TB)

    out = pl.pallas_call(
        _taskc_kernel,
        out_shape=jax.ShapeDtypeStruct((num_tiles, 1, TB), x.dtype),
        grid_spec=pltpu.PrefetchScalarGridSpec(
            num_scalar_prefetch=0,
            grid=(num_tiles,),
            in_specs=[
                # x: batch-tiled and software-pipelined; ragged tail handled
                # by Pallas (no wrapper-side pad, no extra HBM traffic).
                pl.BlockSpec((TB, D), lambda i: (i, 0)),
                # w: constant index map -> DMA'd once, stays VMEM-resident.
                pl.BlockSpec((D, 1), lambda i: (0, 0)),
                # bias: scalar in SMEM.
                pl.BlockSpec((1, 1), lambda i: (0, 0),
                             memory_space=pltpu.MemorySpace.SMEM),
            ],
            # Lane-dense output row per batch tile.
            out_specs=pl.BlockSpec((1, 1, TB), lambda i: (i, 0, 0)),
        ),
        compiler_params=pltpu.CompilerParams(
            # Batch tiles are independent: lets v7x shard the grid across both
            # TensorCores; near-neutral on single-core v5e/v6e.
            dimension_semantics=("parallel",),
            vmem_limit_bytes=_vmem_limit_bytes(TB, D, itemsize),
        ),
    )(x, w_col, b2)

    # Tiny relayout of the (num_tiles, 1, TB) slab back to (B, 1). Any garbage
    # tail rows from a ragged last tile are sliced off here, immediately next
    # to the pallas_call.
    return out.reshape(num_tiles * TB, 1)[:B]


if __name__ == "__main__":
    d_model = 128
    batch = 8

    key = jax.random.PRNGKey(0)
    kx, kw, kb = jax.random.split(key, 3)

    # Deterministic parameters (mimic nn.Linear(d_model, 1) shapes).
    x = jax.random.normal(kx, (batch, d_model), dtype=jnp.float32)
    w = jax.random.normal(kw, (d_model, 1), dtype=jnp.float32) * 0.05
    b = jax.random.normal(kb, (1, 1), dtype=jnp.float32) * 0.05

    out = taskc_forward(x, w, b)
    out = jax.block_until_ready(out)

    # Pure-JAX reference check.
    ref = jax.nn.sigmoid(x @ w + b[0, 0])
    assert out.shape == (batch, 1)
    assert jnp.allclose(out, ref, atol=1e-5), "mismatch vs reference"

    # Secondary check: batch not a multiple of 8 (single full-array block).
    x2 = jax.random.normal(kx, (10, d_model), dtype=jnp.float32)
    out2 = jax.block_until_ready(taskc_forward(x2, w, b))
    ref2 = jax.nn.sigmoid(x2 @ w + b[0, 0])
    assert out2.shape == (10, 1)
    assert jnp.allclose(out2, ref2, atol=1e-5), "mismatch vs reference (ragged B)"

    print("KERNEL_OK")
</pallas_src>

<mosaic_0001>
module attributes {stable_mosaic.version = 11 : i64} {
  func.func @_taskc_kernel(%arg0: i32, %arg1: memref<8x128xf32, #tpu.memory_space<vmem>>, %arg2: memref<128x1xf32, #tpu.memory_space<vmem>>, %arg3: memref<1x1xf32, #tpu.memory_space<smem>>, %arg4: memref<1x1x8xf32, #tpu.memory_space<vmem>>) attributes {dimension_semantics = [#tpu.dimension_semantics<parallel>], iteration_bounds = array<i64: 1>, scalar_prefetch = 0 : i64, scratch_operands = 0 : i64, tpu.core_type = #tpu.core_type<tc>, window_params = [{transform_indices = @transform_0, window_bounds = array<i64: 8, 128>}, {pipeline_mode = #tpu.pipeline_mode<synchronous>, transform_indices = @transform_1, window_bounds = array<i64: 128, 1>}, {transform_indices = @transform_2, window_bounds = array<i64: 1, 1>}, {transform_indices = @transform_3, window_bounds = array<i64: 1, 1, 8>}]} {
    %c0 = arith.constant 0 : index
    %c0_0 = arith.constant 0 : index
    %0 = vector.load %arg1[%c0, %c0_0] : memref<8x128xf32, #tpu.memory_space<vmem>>, vector<8x128xf32>
    %c0_1 = arith.constant 0 : index
    %c0_2 = arith.constant 0 : index
    %1 = vector.load %arg2[%c0_1, %c0_2] : memref<128x1xf32, #tpu.memory_space<vmem>>, vector<128x1xf32>
    %cst = arith.constant dense<0.000000e+00> : vector<8x1xf32>
    %2 = tpu.matmul %0, %1, %cst {dimension_numbers = #tpu.dot_dimension_numbers<[1], [0], [0], [1], [0, 0, 1, 1], [], []>} : vector<8x128xf32>, vector<128x1xf32>, vector<8x1xf32> -> vector<8x1xf32>
    %3 = vector.shape_cast %2 : vector<8x1xf32> to vector<1x1x8xf32>
    %c0_3 = arith.constant 0 : index
    %c0_4 = arith.constant 0 : index
    %4 = memref.load %arg3[%c0_3, %c0_4] : memref<1x1xf32, #tpu.memory_space<smem>>
    %5 = vector.broadcast %4 : f32 to vector<1x1x8xf32>
    %6 = arith.addf %3, %5 : vector<1x1x8xf32>
    %7 = arith.negf %6 : vector<1x1x8xf32>
    %8 = math.exp %7 : vector<1x1x8xf32>
    %cst_5 = arith.constant 1.000000e+00 : f32
    %9 = vector.broadcast %cst_5 : f32 to vector<1x1x8xf32>
    %10 = arith.addf %9, %8 : vector<1x1x8xf32>
    %11 = arith.divf %9, %10 : vector<1x1x8xf32>
    %c0_6 = arith.constant 0 : index
    %c0_7 = arith.constant 0 : index
    %c0_8 = arith.constant 0 : index
    %12 = vector.load %arg4[%c0_6, %c0_7, %c0_8] : memref<1x1x8xf32, #tpu.memory_space<vmem>>, vector<1x1x8xf32>
    tpu.vector_store %arg4[%c0_6, %c0_7, %c0_8], %11 {strides = array<i32>} : memref<1x1x8xf32, #tpu.memory_space<vmem>>, vector<1x1x8xf32>,
    return
  }
  func.func @transform_0(%arg0: i32) -> (i32, i32) {
    %c0_i32 = arith.constant 0 : i32
    %c0_i32_0 = arith.constant 0 : i32
    return %arg0, %c0_i32 : i32, i32
  }
  func.func @transform_1(%arg0: i32) -> (i32, i32) {
    %c0_i32 = arith.constant 0 : i32
    %c0_i32_0 = arith.constant 0 : i32
    %c0_i32_1 = arith.constant 0 : i32
    return %c0_i32, %c0_i32_0 : i32, i32
  }
  func.func @transform_2(%arg0: i32) -> (i32, i32) {
    %c0_i32 = arith.constant 0 : i32
    %c0_i32_0 = arith.constant 0 : i32
    %c0_i32_1 = arith.constant 0 : i32
    return %c0_i32, %c0_i32_0 : i32, i32
  }
  func.func @transform_3(%arg0: i32) -> (i32, i32, i32) {
    %c0_i32 = arith.constant 0 : i32
    %c0_i32_0 = arith.constant 0 : i32
    %c0_i32_1 = arith.constant 0 : i32
    return %arg0, %c0_i32, %c0_i32_0 : i32, i32, i32
  }
}

</mosaic_0001>

<bundles_post_ra>
// kernel: tpu_custom_call.1
= control target key start
LH: loop header
LB: loop body
LE: loop exit
PB: predicated region body
PF: predicated region fallthrough
CT: control target
= control target key end

     0   :  { %v223_v1 = vmov 0.0   ;;  %vm224_vm0 = vmmov 0   ;;  %s304_s0 = inlined_call_operand.vmem [shape: f32[8,128], index: 0, kind: input, shape index: {}]   ;;  %s305_s1 = inlined_call_operand.vmem [shape: f32[128,1], index: 1, kind: input, shape index: {}]   ;;  %s306_s2 = inlined_call_operand.<no memory space> [shape: f32[1,1], index: 2, kind: input, shape index: {}]   ;;  %s307_s3 = inlined_call_operand.hbm [shape: f32[1,1,8], index: 3, kind: output, shape index: {}]  }
   0x1   :  { %v32_v0 = vld [vmem:[%s305_s1 + $0x78] sm:$0xff]  ;;  %157 = vmatprep.subr.mxu0 %v223_v1  ;;  %v31_v2 = vld [vmem:[%s305_s1 + $0x70] sm:$0xff]  ;;  %189 = vmatprep.mubr.msk.f32.mxu0 %vm224_vm0, %v223_v1  ;;  %v30_v3 = vld [vmem:[%s305_s1 + $0x68] sm:$0xff] }
   0x2   :  { %158 = vmatpush3.msra.mxu0 %v32_v0  ;;  %v29_v4 = vld [vmem:[%s305_s1 + $0x60] sm:$0xff] }
   0x3   :  { %159 = vmatprep.subr.mxu0 %v223_v1 }
   0x4   :  { %160 = vmatpush3.msra.mxu0 %v31_v2 }
   0x5   :  { %161 = vmatprep.subr.mxu0 %v223_v1 }
   0x6   :  { %9 = vsyncpa [#allocation4], 0  ;;  %162 = vmatpush3.msra.mxu0 %v30_v3  ;;  %v28_v5 = vld [vmem:[%s305_s1 + $0x58] sm:$0xff]  ;;  %v27_v6 = vld [vmem:[%s305_s1 + $0x50] sm:$0xff]  ;;  %v225_v18 = vmov 0   ;;  %v104_v19 = vstv %s306_s2  ;;  %v116_v27 = vlaneseq  ;;  %vm123_vm1 = vcmask 57344  }
   0x7   :  { %163 = vmatprep.subr.mxu0 %v223_v1  ;;  %v26_v7 = vld [vmem:[%s305_s1 + $0x48] sm:$0xff]  ;;  %v25_v8 = vld [vmem:[%s305_s1 + $0x40] sm:$0xff]  ;;  %v24_v9 = vld [vmem:[%s305_s1 + $0x38] sm:$0xff]  ;;  %196 = vset.pattern.permute.xlu0 %v225_v18 }
   0x8   :  { %164 = vmatpush3.msra.mxu0 %v29_v4  ;;  %v23_v10 = vld [vmem:[%s305_s1 + $0x30] sm:$0xff]  ;;  %v22_v11 = vld [vmem:[%s305_s1 + $0x28] sm:$0xff]  ;;  %v21_v12 = vld [vmem:[%s305_s1 + $0x20] sm:$0xff]  ;;  %v117_v28 = vand.u32 127, %v116_v27  ;;  %v119_v29 = vshrl.u32 %v116_v27, 7 }
   0x9   :  { %165 = vmatprep.subr.mxu0 %v223_v1  ;;  %v20_v13 = vld [vmem:[%s305_s1 + $0x18] sm:$0xff]  ;;  %v19_v14 = vld [vmem:[%s305_s1 + $0x10] sm:$0xff]  ;;  %v18_v15 = vld [vmem:[%s305_s1 + $0x8] sm:$0xff] }
   0xa   :  { %166 = vmatpush3.msra.mxu0 %v28_v5  ;;  %v17_v16 = vld [vmem:[%s305_s1] sm:$0xff]  ;;  %v120_v30 = vsub.s32 %v117_v28, %v119_v29 }
   0xb   :  { %167 = vmatprep.subr.mxu0 %v223_v1  ;;  %v16_v17 = vld [vmem:[%s304_s0] sm:$0xff]  ;;  %s226_s0 = smov [#allocation3]  }
   0xc   :  { %168 = vmatpush3.msra.mxu0 %v27_v6  ;;  %s131_s1 = sshll.u32 %s226_s0, 4  ;;  %s132_s1 = int_to_ptr.vmem [resolvable:$true] %s131_s1 }
   0xd   :  { %169 = vmatprep.subr.mxu0 %v223_v1  ;;  %s201_s2 = scalar_lea.vmem %s132_s1, 16  ;;  %s205_s21 = scalar_lea.vmem %s132_s1, 32 }
   0xe   :  { %170 = vmatpush3.msra.mxu0 %v26_v7  ;;  %p202_p0 = scmp.ne.s32.totalorder %s132_s1, %s201_s2  ;;  %p206_p1 = scmp.lt.s32.totalorder %s132_s1, %s132_s1 }
   0xf   :  { %171 = vmatprep.subr.mxu0 %v223_v1  ;;  %p207_p2 = scmp.lt.s32.totalorder %s205_s21, %s201_s2 }
  0x10   :  { %172 = vmatpush3.msra.mxu0 %v25_v8 }
  0x11   :  { %173 = vmatprep.subr.mxu0 %v223_v1  ;;  %p208_p3 = por %p207_p2, %p206_p1 }
  0x12   :  { %174 = vmatpush3.msra.mxu0 %v24_v9 }
  0x13   :  { %175 = vmatprep.subr.mxu0 %v223_v1  ;;  %p209_p4 = pnand %p208_p3, %p202_p0 }
  0x14   :  { %176 = vmatpush3.msra.mxu0 %v23_v10 }
  0x15   :  { %177 = vmatprep.subr.mxu0 %v223_v1 }
  0x16   :  { %178 = vmatpush3.msra.mxu0 %v22_v11 }
  0x17   :  { %179 = vmatprep.subr.mxu0 %v223_v1 }
  0x18   :  { %180 = vmatpush3.msra.mxu0 %v21_v12 }
  0x19   :  { %181 = vmatprep.subr.mxu0 %v223_v1 }
  0x1a   :  { %182 = vmatpush3.msra.mxu0 %v20_v13 }
  0x1b   :  { %183 = vmatprep.subr.mxu0 %v223_v1 }
  0x1c   :  { %184 = vmatpush3.msra.mxu0 %v19_v14 }
  0x1d   :  { %185 = vmatprep.subr.mxu0 %v223_v1 }
  0x1e   :  { %186 = vmatpush3.msra.mxu0 %v18_v15 }
  0x1f   :  { %187 = vmatprep.subr.mxu0 %v223_v1 }
  0x20   :  { %188 = vmatpush3.msra.mxu0 %v17_v16 }
  0x21   :  { %190 = vmatmul.mubr.f32.vlgmr.msra.gmra.mxu0 %v16_v17 }
  0xe1   :  { %v99_v20 = vpop.f32.mrf.mxu0 }
  0xe2   :  { %v105_v21 = vadd.f32 %v104_v19, %v99_v20 }
  0xe3   :  { %v191_v22 = vpop.f32.mrf.mxu0 }
  0xe4   :  { %v139_v23 = vmul.f32 -1.442695, %v105_v21 }
  0xe6   :  { %197 = vpow2.f32 %v139_v23 }
  0xf3   :  { %v198_v24 = vpop.eup %197 }
  0xf4   :  { %v109_v25 = vadd.f32 1.0, %v198_v24 }
  0xf6   :  { %199 = vrcp.f32 %v109_v25 }
 0x103   :  { %v200_v26 = vpop.eup %199 }
 0x104   :  { %114 = vperm.xlu0 %196, %v200_v26  }
 0x17f   :  { %v115_v31 = vpop.permute.xlu0 %114 }
 0x180   :  { %v121_v32 = vrot.slane %v115_v31, %v120_v30 }
 0x182   :  { %124 = vst.msk [vmem:[#allocation3] sm:$0x1] %vm123_vm1, %v121_v32 }
 0x183   :  { %212 = shalt.err (!%p209_p4)
}
 0x184   :  { %134 = dma.vmem_to_hbm [thread:$0]  %s132_s1, 16, %s307_s3, [#allocation4]  }
 0x185   :  { %221 = dma.done.wait [#allocation4], 16  }
 0x186   :  { %222 = vsyncadd [#allocation4], 4294967280 }
 0x187   :  { %138 = vsyncpa [#allocation4], 1 }

</bundles_post_ra>
